<compile_context>
chip_gen: v7x
topology: tpu7x:2x2x1
jax: 0.10.0
libtpu: 0.0.40
codegen_flags: <defaults>
</compile_context>

<pallas_src>
import functools

import jax
import jax.numpy as jnp
import numpy as np
from jax.experimental import pallas as pl
from jax.experimental.pallas import tpu as pltpu


def _gem_kernel(p_ref, x_ref, o_ref, *, eps, hw):
    """One row-block: rows = (batch, channel) pairs, lanes = flattened H*W."""
    p = p_ref[0]                                    # learned scalar, from SMEM
    rt = x_ref.shape[0]                             # row_block (static)

    def powp(chunk):                                # clamp(min=eps) then x**p (EUP)
        xc = jnp.maximum(chunk.astype(jnp.float32), eps)
        return jnp.exp(p * jnp.log(xc))             # eps > 0 so log is safe

    def rowsum(a):                                  # (rt, w) -> (1, rt) lane-dense sum
        ones = jnp.ones((1, a.shape[1]), jnp.float32)
        return jax.lax.dot_general(
            ones, a, (((1,), (1,)), ((), ())),
            preferred_element_type=jnp.float32,
            precision=jax.lax.Precision.HIGHEST)    # exact-ish f32 accumulation on MXU

    n_full = hw // 128
    rem = hw - n_full * 128

    parts = []
    if n_full > 0:
        acc = powp(x_ref[:, 0:128])                 # VPU partial sums across lane columns
        for c in range(1, n_full):
            acc = acc + powp(x_ref[:, c * 128:(c + 1) * 128])
        parts.append(rowsum(acc))
    if rem > 0:                                     # tail when HW % 128 != 0
        parts.append(rowsum(powp(x_ref[:, n_full * 128:hw])))

    row_sum = parts[0]
    for t in parts[1:]:
        row_sum = row_sum + t

    m = row_sum * (1.0 / hw)                        # avg_pool2d over full (H, W)
    o_ref[...] = jnp.exp(jnp.log(m) * (1.0 / p))    # m ** (1/p), lane-dense (1, rt)


def gem_pallas(x, p, eps=1e-6):
    """GeM pooling. x: (B, C, H, W) -> (B, C, 1, 1)."""
    assert eps > 0.0, "GeM kernel requires eps > 0 (log of clamped input)."
    B, C, H, W = x.shape
    BC, HW = B * C, H * W
    xf = x.reshape(BC, HW)                          # free reshape, native dtype (no HBM copy)

    itemsize = jnp.dtype(x.dtype).itemsize
    sublane = {4: 8, 2: 16, 1: 32}.get(itemsize, 8)  # sublane packing for the dtype
    bytes_per_row = itemsize * HW

    def round_up(a, b):
        return -(-a // b) * b

    TARGET_BLOCK_BYTES = 8 * 1024 * 1024            # ~8 MiB input per pipelined block
    MAX_ROWS = 4096                                 # keeps per-chunk f32 temps modest
    fit_rows = (TARGET_BLOCK_BYTES // max(bytes_per_row, 1)) // sublane * sublane
    max_rows = max(sublane, min(MAX_ROWS, fit_rows))
    split_rows = round_up(pl.cdiv(BC, 4), sublane)  # aim for >=4 grid steps (v7x 2-TC split)
    row_block = max(sublane, min(max_rows, split_rows, round_up(BC, sublane)))
    num_blocks = pl.cdiv(BC, row_block)             # partial last block is fine (per-row math)

    block_bytes = row_block * bytes_per_row
    vmem_limit = int(max(32 * 1024 * 1024, 4 * block_bytes))  # safe on v5e/v6e/v7x

    p_arr = jnp.asarray(p, jnp.float32).reshape(1)

    out = pl.pallas_call(
        functools.partial(_gem_kernel, eps=float(eps), hw=HW),
        out_shape=jax.ShapeDtypeStruct((num_blocks, row_block), jnp.float32),
        grid=(num_blocks,),
        in_specs=[
            pl.BlockSpec(memory_space=pltpu.MemorySpace.SMEM),   # p: (1,) scalar
            pl.BlockSpec((row_block, HW), lambda i: (i, 0)),     # x row-block, lane-dense
        ],
        out_specs=pl.BlockSpec((1, row_block), lambda i: (i, 0)),  # lane-dense output row
        compiler_params=pltpu.CompilerParams(
            dimension_semantics=("parallel",),
            vmem_limit_bytes=vmem_limit),
    )(p_arr, xf)

    return out.reshape(-1)[:BC].reshape(B, C, 1, 1).astype(x.dtype)


def gem_reference(x, p, eps=1e-6):
    """Pure-JAX reference mirroring the PyTorch GeM.forward."""
    xc = jnp.maximum(x, eps)
    xp = jnp.power(xc, p)
    m = jnp.mean(xp, axis=(-2, -1), keepdims=True)
    return jnp.power(m, 1.0 / p)


if __name__ == "__main__":
    B, C, H, W = 2, 4, 16, 16
    key = jax.random.PRNGKey(0)
    x = jax.random.normal(key, (B, C, H, W), jnp.float32)
    p = jnp.ones((1,), jnp.float32) * 3.0           # nn.Parameter(torch.ones(1) * 3)
    eps = 1e-6

    out = jax.block_until_ready(gem_pallas(x, p, eps))
    ref = gem_reference(x, p, eps)

    assert out.shape == (B, C, 1, 1)
    np.testing.assert_allclose(np.asarray(out), np.asarray(ref),
                               rtol=2e-4, atol=1e-5)
    print("KERNEL_OK")
</pallas_src>

<mosaic_0001>
module attributes {stable_mosaic.version = 11 : i64} {
  func.func @_gem_kernel(%arg0: i32, %arg1: memref<1xf32, #tpu.memory_space<smem>>, %arg2: memref<8x256xf32, #tpu.memory_space<vmem>>, %arg3: memref<1x8xf32, #tpu.memory_space<vmem>>) attributes {dimension_semantics = [#tpu.dimension_semantics<parallel>], iteration_bounds = array<i64: 1>, scalar_prefetch = 0 : i64, scratch_operands = 0 : i64, tpu.core_type = #tpu.core_type<tc>, window_params = [{transform_indices = @transform_0, window_bounds = array<i64: 1>}, {transform_indices = @transform_1, window_bounds = array<i64: 8, 256>}, {transform_indices = @transform_2, window_bounds = array<i64: 1, 8>}]} {
    %c0 = arith.constant 0 : index
    %0 = memref.load %arg1[%c0] : memref<1xf32, #tpu.memory_space<smem>>
    %c0_0 = arith.constant 0 : index
    %c0_1 = arith.constant 0 : index
    %1 = vector.load %arg2[%c0_0, %c0_1] : memref<8x256xf32, #tpu.memory_space<vmem>>, vector<8x128xf32>
    %cst = arith.constant 9.99999997E-7 : f32
    %2 = vector.broadcast %cst : f32 to vector<8x128xf32>
    %3 = arith.maximumf %1, %2 : vector<8x128xf32>
    %4 = math.log %3 : vector<8x128xf32>
    %5 = vector.broadcast %0 : f32 to vector<8x128xf32>
    %6 = arith.mulf %5, %4 : vector<8x128xf32>
    %7 = math.exp %6 : vector<8x128xf32>
    %c0_2 = arith.constant 0 : index
    %c128 = arith.constant 128 : index
    %8 = vector.load %arg2[%c0_2, %c128] : memref<8x256xf32, #tpu.memory_space<vmem>>, vector<8x128xf32>
    %cst_3 = arith.constant 9.99999997E-7 : f32
    %9 = vector.broadcast %cst_3 : f32 to vector<8x128xf32>
    %10 = arith.maximumf %8, %9 : vector<8x128xf32>
    %11 = math.log %10 : vector<8x128xf32>
    %12 = vector.broadcast %0 : f32 to vector<8x128xf32>
    %13 = arith.mulf %12, %11 : vector<8x128xf32>
    %14 = math.exp %13 : vector<8x128xf32>
    %15 = arith.addf %7, %14 : vector<8x128xf32>
    %cst_4 = arith.constant 1.000000e+00 : f32
    %16 = vector.broadcast %cst_4 : f32 to vector<1x128xf32>
    %cst_5 = arith.constant dense<0.000000e+00> : vector<1x8xf32>
    %17 = tpu.matmul %16, %15, %cst_5 {dimension_numbers = #tpu.dot_dimension_numbers<[1], [1], [0], [0], [0, 0, 1, 0], [], []>, precision = #tpu.contract_precision<fp32>} : vector<1x128xf32>, vector<8x128xf32>, vector<1x8xf32> -> vector<1x8xf32>
    %cst_6 = arith.constant 3.906250e-03 : f32
    %18 = vector.broadcast %cst_6 : f32 to vector<1x8xf32>
    %19 = arith.mulf %17, %18 : vector<1x8xf32>
    %20 = math.log %19 : vector<1x8xf32>
    %cst_7 = arith.constant 1.000000e+00 : f32
    %21 = arith.divf %cst_7, %0 : f32
    %22 = vector.broadcast %21 : f32 to vector<1x8xf32>
    %23 = arith.mulf %20, %22 : vector<1x8xf32>
    %24 = math.exp %23 : vector<1x8xf32>
    %c0_8 = arith.constant 0 : index
    %c0_9 = arith.constant 0 : index
    %25 = vector.load %arg3[%c0_8, %c0_9] : memref<1x8xf32, #tpu.memory_space<vmem>>, vector<1x8xf32>
    tpu.vector_store %arg3[%c0_8, %c0_9], %24 {strides = array<i32>} : memref<1x8xf32, #tpu.memory_space<vmem>>, vector<1x8xf32>,
    return
  }
  func.func @transform_0(%arg0: i32) -> i32 {
    %c0_i32 = arith.constant 0 : i32
    %c0_i32_0 = arith.constant 0 : i32
    return %c0_i32 : i32
  }
  func.func @transform_1(%arg0: i32) -> (i32, i32) {
    %c0_i32 = arith.constant 0 : i32
    %c0_i32_0 = arith.constant 0 : i32
    return %arg0, %c0_i32 : i32, i32
  }
  func.func @transform_2(%arg0: i32) -> (i32, i32) {
    %c0_i32 = arith.constant 0 : i32
    %c0_i32_0 = arith.constant 0 : i32
    return %arg0, %c0_i32 : i32, i32
  }
}

</mosaic_0001>

<bundles_post_ra>
// kernel: tpu_custom_call.1
= control target key start
LH: loop header
LB: loop body
LE: loop exit
PB: predicated region body
PF: predicated region fallthrough
CT: control target
= control target key end

     0   :  { %8 = vsyncpa [#allocation4], 0  ;;  %s675_s0 = inlined_call_operand.<no memory space> [shape: f32[1], index: 0, kind: input, shape index: {}]   ;;  %s676_s1 = inlined_call_operand.hbm [shape: f32[8,256], index: 1, kind: input, shape index: {}]   ;;  %s677_s2 = inlined_call_operand.hbm [shape: f32[1,8], index: 2, kind: output, shape index: {}]  }
   0x1   :  { %9 = vsyncpa [#allocation5], 0  ;;  %s622_s9 = smov [#allocation3]   ;;  %s574_s13 = scalar_lea.hbm %s676_s1, 256 }
   0x2   :  { %s18_s10 = sshll.u32 %s622_s9, 4  ;;  %p575_p0 = scmp.ne.s32.totalorder %s676_s1, %s574_s13  ;;  %s19_s10 = int_to_ptr.vmem [resolvable:$true] %s18_s10 }
   0x3   :  { %p578_p1 = scmp.lt.u32.totalorder %s574_s13, %s676_s1 }
   0x5   :  { %p580_p2 = pnand %p578_p1, %p575_p0 }
   0x7   :  { %583 = shalt.err (!%p580_p2)
}
   0x8   :  { %s584_s18 = scalar_lea.vmem %s19_s10, 256  ;;  %p589_p4 = scmp.lt.s32.totalorder %s19_s10, %s19_s10 }
   0x9   :  { %p585_p3 = scmp.ne.s32.totalorder %s19_s10, %s584_s18  ;;  %p590_p5 = scmp.lt.s32.totalorder %s584_s18, %s584_s18 }
   0xb   :  { %p591_p6 = por %p590_p5, %p589_p4 }
   0xd   :  { %p592_p7 = pnand %p591_p6, %p585_p3 }
   0xf   :  { %595 = shalt.err (!%p592_p7)
}
  0x10   :  { %21 = dma.hbm_to_vmem [thread:$0]  %s676_s1, 256, %s19_s10, [#allocation4]  }
  0x11   :  { %618 = dma.done.wait [#allocation4], 256  }
  0x12   :  { %619 = vsyncadd [#allocation4], 4294967040  ;;  %v30_v0 = vstv %s675_s0  ;;  %v623_v1 = vmov 0.0   ;;  %vm624_vm0 = vmmov 0   ;;  %v26_v2 = vld [vmem:[#allocation3] sm:$0xff]  ;;  %v34_v3 = vld [vmem:[#allocation3 + $0x8] sm:$0xff] }
  0x13   :  { %514 = vmatprep.subr.mxu1 %v623_v1  ;;  %529 = vmatprep.subr.mxu0 %v623_v1  ;;  %560 = vrcp.f32 %v30_v0  ;;  %v27_v4 = vmax.f32 %v26_v2, 1e-06  ;;  %v35_v5 = vmax.f32 %v34_v3, 1e-06  ;;  %v625_v23 = vmov 1.0   ;;  %s626_s1 = smov [#allocation6]  }
  0x14   :  { %516 = vmatprep.mubr.msk.f32.mxu1 %vm624_vm0, %v623_v1  ;;  %531 = vmatprep.mubr.msk.f32.mxu0 %vm624_vm0, %v623_v1  ;;  %s493_s23 = sshll.u32 %s626_s1, 4  ;;  %vm485_vm1 = vcmask 57344   ;;  %s494_s23 = int_to_ptr.vmem [resolvable:$true] %s493_s23 }
  0x15   :  { %562 = vlog2.f32 %v27_v4  ;;  %s596_s24 = scalar_lea.vmem %s494_s23, 16  ;;  %s600_s25 = scalar_lea.vmem %s494_s23, 32 }
  0x16   :  { %564 = vlog2.f32 %v35_v5  ;;  %p597_p8 = scmp.ne.s32.totalorder %s494_s23, %s596_s24  ;;  %p601_p9 = scmp.lt.s32.totalorder %s494_s23, %s494_s23 }
  0x17   :  { %p602_p10 = scmp.lt.s32.totalorder %s600_s25, %s596_s24 }
  0x19   :  { %p603_p11 = por %p602_p10, %p601_p9 }
  0x1b   :  { %p604_p12 = pnand %p603_p11, %p597_p8 }
  0x1d   :  { %v561_v6 = vpop.eup %560 }
  0x1e   :  { %553 = vpush %v561_v6 }
  0x1f   :  { %v563_v7 = vpop.eup %562 }
  0x20   :  { %v565_v8 = vpop.eup %564  ;;  %v29_v9 = vmul.f32 0.6931472, %v563_v7 }
  0x21   :  { %v37_v10 = vmul.f32 0.6931472, %v565_v8 }
  0x22   :  { %v31_v11 = vmul.f32 %v30_v0, %v29_v9 }
  0x23   :  { %v38_v12 = vmul.f32 %v37_v10, %v30_v0 }
  0x24   :  { %v32_v13 = vmul.f32 1.442695, %v31_v11 }
  0x25   :  { %v39_v14 = vmul.f32 1.442695, %v38_v12 }
  0x26   :  { %566 = vpow2.f32 %v32_v13 }
  0x27   :  { %568 = vpow2.f32 %v39_v14 }
  0x30   :  { %v567_v15 = vpop.eup %566 }
  0x31   :  { %v569_v16 = vpop.eup %568 }
  0x32   :  { %v41_v17 = vadd.f32 %v569_v16, %v567_v15 }
  0x34   :  { %v43_v18 = vand.u32 4294901760, %v41_v17 }
  0x36   :  { %515 = vmatpush3.xpose.msra.mxu1 %v43_v18  ;;  %v115_v19 = vsub.f32 %v41_v17, %v43_v18  ;;  %530 = vmatpush3.xpose.msra.mxu0 %v43_v18 }
  0x37   :  { %519 = vmatprep.subr.mxu1 %v623_v1  ;;  %534 = vmatprep.subr.mxu0 %v623_v1 }
  0x38   :  { %v116_v20 = vand.u32 4294901760, %v115_v19 }
  0x39   :  { %517 = vmatmul.mubr.f32.vlgmr.msra.gmra.mrb[0].mxu1 %v623_v1  ;;  %532 = vmatmul.mubr.f32.vlgmr.msra.gmra.mrb[0].mxu0 %v623_v1 }
  0x3a   :  { %v117_v21 = vsub.f32 %v115_v19, %v116_v20  ;;  %535 = vmatpush3.xpose.msra.mxu0 %v116_v20  ;;  %521 = vmatprep.mubr.msk.f32.mxu1 %vm624_vm0, %v623_v1 }
  0x3b   :  { %536 = vmatprep.mubr.msk.f32.mxu0 %vm624_vm0, %v623_v1  ;;  %539 = vmatprep.subr.mxu0 %v623_v1 }
  0x3c   :  { %v118_v22 = vand.u32 4294901760, %v117_v21 }
  0x3e   :  { %520 = vmatpush3.xpose.msra.mxu1 %v118_v22 }
  0x3f   :  { %524 = vmatprep.subr.mxu1 %v623_v1 }
  0x41   :  { %522 = vmatmul.mubr.f32.vlgmr.msra.gmra.mrb[0].mxu1 %v625_v23  ;;  %537 = vmatmul.mubr.f32.vlgmr.msra.gmra.mrb[0].mxu0 %v625_v23 }
  0x42   :  { %525 = vmatpush3.xpose.msra.mxu1 %v115_v19  ;;  %540 = vmatpush3.xpose.msra.mxu0 %v43_v18 }
  0x43   :  { %526 = vmatprep.mubr.msk.f32.mxu1 %vm624_vm0, %v623_v1  ;;  %541 = vmatprep.mubr.msk.f32.mxu0 %vm624_vm0, %v623_v1 }
  0x49   :  { %527 = vmatmul.mubr.f32.vlgmr.msra.gmra.mrb[0].mxu1 %v623_v1  ;;  %542 = vmatmul.mubr.f32.vlgmr.msra.gmra.mrb[0].mxu0 %v625_v23 }
  0x4f   :  { %s554_s0 = spop %553 }
  0x50   :  { %v481_v31 = vstv %s554_s0 }
 0x11c   :  { %v256_v24 = vpop.f32.mrb[0].mxu1  ;;  %v471_v25 = vpop.f32.mrb[0].mxu0 }
 0x11d   :  { %v544_v26 = vadd.f32 %v471_v25, %v256_v24  ;;  %v528_v27 = vpop.f32.mrb[1].mxu1  ;;  %v543_v28 = vpop.f32.mrb[1].mxu0 }
 0x11f   :  { %v475_v29 = vmul.f32 0.00390625, %v544_v26 }
 0x121   :  { %570 = vlog2.f32 %v475_v29 }
 0x12b   :  { %v571_v30 = vpop.eup %570 }
 0x12c   :  { %v477_v32 = vmul.f32 0.6931472, %v571_v30 }
 0x12e   :  { %v482_v33 = vmul.f32 %v481_v31, %v477_v32 }
 0x130   :  { %v483_v34 = vmul.f32 1.442695, %v482_v33 }
 0x132   :  { %572 = vpow2.f32 %v483_v34 }
 0x13c   :  { %v573_v35 = vpop.eup %572 }
 0x13d   :  { %486 = vst.msk [vmem:[#allocation6] sm:$0x1] %vm485_vm1, %v573_v35 }
 0x13e   :  { %607 = shalt.err (!%p604_p12)
}
 0x13f   :  { %s608_s28 = scalar_lea.hbm %s677_s2, 16 }
 0x140   :  { %p609_p13 = scmp.ne.s32.totalorder %s677_s2, %s608_s28  ;;  %p612_p0 = scmp.lt.u32.totalorder %s608_s28, %s677_s2 }
 0x142   :  { %p614_p1 = pnand %p612_p0, %p609_p13 }
 0x144   :  { %617 = shalt.err (!%p614_p1)
}
 0x145   :  { %496 = dma.vmem_to_hbm [thread:$0]  %s494_s23, 16, %s677_s2, [#allocation5]  }
 0x146   :  { %620 = dma.done.wait [#allocation5], 16  }
 0x147   :  { %621 = vsyncadd [#allocation5], 4294967280 }
 0x148   :  { %500 = vsyncpa [#allocation4], 1 }
 0x149   :  { %501 = vsyncpa [#allocation5], 1 }

</bundles_post_ra>
